<compile_context>
chip_gen: v7x
topology: tpu7x:2x2x1
jax: 0.10.0
libtpu: 0.0.40
codegen_flags: <defaults>
</compile_context>

<pallas_src>
import math

import jax
import jax.numpy as jnp
from jax import lax
from jax.experimental import pallas as pl
from jax.experimental.pallas import tpu as pltpu


def _round_up(x, m):
    return ((x + m - 1) // m) * m


# ----------------------------------------------------------------------------
# Stage 1: fused QKV projection -> head-major (B, H, T, head_dim) tensors
# ----------------------------------------------------------------------------
def _qkv_proj_kernel(x_ref, wq_ref, wk_ref, wv_ref, q_ref, k_ref, v_ref):
    # x_ref:  (1, t_blk, d_in)           activations block
    # w*_ref: (d_in, d_out)              pre-transposed weights (scale folded into wq)
    # q/k/v_ref: (1, H, t_blk, head_dim) head-major outputs
    x = x_ref[0]
    num_heads = q_ref.shape[1]
    head_dim = q_ref.shape[3]

    for w_ref, o_ref in ((wq_ref, q_ref), (wk_ref, k_ref), (wv_ref, v_ref)):
        # One wide (t, d_in) x (d_in, d_out) MXU matmul, then static per-head
        # lane slices (better MXU utilization than H small-N matmuls).
        proj = jnp.dot(x, w_ref[...], preferred_element_type=jnp.float32)
        for h in range(num_heads):
            o_ref[0, h] = proj[:, h * head_dim:(h + 1) * head_dim].astype(o_ref.dtype)


# ----------------------------------------------------------------------------
# Stage 2: flash attention (online softmax, causal block skipping) + out-proj
# ----------------------------------------------------------------------------
def _flash_attn_kernel(q_ref, k_ref, v_ref, wo_ref, bo_ref, o_ref,
                       m_sc, l_sc, acc_sc):
    # q/k/v_ref: (1, H, t_blk, head_dim)   (softmax scale already folded into q)
    # wo_ref:    (d_out, d_out_pad)        pre-transposed, zero-padded to lane-dense
    # bo_ref:    (1, d_out_pad)            f32 bias
    # o_ref:     (1, t_blk, d_out_pad)
    # scratch:   m_sc/l_sc (H, t_blk, 1) f32, acc_sc (H, t_blk, head_dim) f32
    qi = pl.program_id(1)
    ki = pl.program_id(2)
    nk = pl.num_programs(2)
    num_heads = q_ref.shape[1]
    t_blk = q_ref.shape[2]

    neg_big = -1e30  # finite "-inf": avoids 0*inf / NaN edge cases

    @pl.when(ki == 0)
    def _init():
        m_sc[...] = jnp.full(m_sc.shape, neg_big, m_sc.dtype)
        l_sc[...] = jnp.zeros(l_sc.shape, l_sc.dtype)
        acc_sc[...] = jnp.zeros(acc_sc.shape, acc_sc.dtype)

    def _scores():
        # (H, tq, tk) f32; scale folded into W_query in the wrapper.
        return jnp.einsum('htd,hsd->hts', q_ref[0], k_ref[0],
                          preferred_element_type=jnp.float32)

    def _online_softmax_update(s):
        m_prev = m_sc[...]
        m_new = jnp.maximum(m_prev, s.max(axis=-1, keepdims=True))
        alpha = jnp.exp(m_prev - m_new)                      # EUP
        p = jnp.exp(s - m_new)                               # (H, tq, tk), EUP
        l_sc[...] = alpha * l_sc[...] + jnp.sum(p, axis=-1, keepdims=True)
        acc_sc[...] = alpha * acc_sc[...] + jnp.einsum(
            'hts,hsd->htd', p.astype(v_ref.dtype), v_ref[0],
            preferred_element_type=jnp.float32)
        m_sc[...] = m_new

    # KV blocks strictly above the causal diagonal are skipped entirely
    # (~2x MXU/VPU saving at large T).
    @pl.when(ki < qi)
    def _below_diag():            # fully unmasked block: no iota/compare/select
        _online_softmax_update(_scores())

    @pl.when(ki == qi)
    def _diag():                  # only the diagonal block needs the causal mask
        s = _scores()
        row = lax.broadcasted_iota(jnp.int32, (t_blk, t_blk), 0)
        col = lax.broadcasted_iota(jnp.int32, (t_blk, t_blk), 1)
        s = jnp.where((col > row)[None, :, :], neg_big, s)
        _online_softmax_update(s)

    @pl.when(ki == nk - 1)        # last grid step for this output tile
    def _finalize():
        l = l_sc[...]
        inv = pl.reciprocal(l, approx=True)                  # EUP
        inv = inv * (2.0 - l * inv)                          # 1 Newton step -> ~f32 exact
        ctx = (acc_sc[...] * inv).astype(wo_ref.dtype)       # (H, tq, head_dim)
        # head-major -> lane-contiguous (tq, d_out) without an XLU transpose+reshape
        ctx2 = jnp.concatenate([ctx[h] for h in range(num_heads)], axis=-1)
        out = jnp.dot(ctx2, wo_ref[...],
                      preferred_element_type=jnp.float32) + bo_ref[...]
        o_ref[0] = out.astype(o_ref.dtype)


# ----------------------------------------------------------------------------
# Wrapper
# ----------------------------------------------------------------------------
def multi_head_attention(x, wq, wk, wv, wo, bo, *, num_heads,
                         compute_dtype=jnp.bfloat16, block_t=128):
    """Causal multi-head attention matching the PyTorch module (eval mode).

    wq/wk/wv/wo are PyTorch-layout (out_features, in_features); bo is (d_out,).
    compute_dtype controls the MXU operand dtype (accumulation is always f32).
    """
    B, T, d_in = x.shape
    d_out = wq.shape[0]
    assert d_out % num_heads == 0, 'd_out must be divisible by num_heads'
    head_dim = d_out // num_heads
    orig_dtype = x.dtype

    # ---- wrapper-side layout plumbing (one-time; keeps transposes out of kernels) ----
    scale = 1.0 / math.sqrt(head_dim)
    wq_t = (wq.T * scale).astype(compute_dtype)          # (d_in, d_out), scale folded in
    wk_t = wk.T.astype(compute_dtype)
    wv_t = wv.T.astype(compute_dtype)

    d_out_p = _round_up(d_out, 128)                      # lane-dense output columns
    wo_t = jnp.pad(wo.T, ((0, 0), (0, d_out_p - d_out))).astype(compute_dtype)
    bo_p = jnp.pad(bo.astype(jnp.float32).reshape(1, d_out),
                   ((0, 0), (0, d_out_p - d_out)))

    # ---- sequence tiling (pad T; causal mask makes padded keys inert) ----
    t_blk = min(block_t, _round_up(T, 8))
    T_p = _round_up(T, t_blk)
    x_p = x if T_p == T else jnp.pad(x, ((0, 0), (0, T_p - T), (0, 0)))
    x_c = x_p.astype(compute_dtype)
    n_t = T_p // t_blk

    # ---- stage 1: fused QKV projection ----
    qkv_shape = jax.ShapeDtypeStruct((B, num_heads, T_p, head_dim), compute_dtype)
    qkv_spec = pl.BlockSpec((1, num_heads, t_blk, head_dim), lambda b, t: (b, 0, t, 0))
    q, k, v = pl.pallas_call(
        _qkv_proj_kernel,
        out_shape=(qkv_shape, qkv_shape, qkv_shape),
        grid_spec=pltpu.PrefetchScalarGridSpec(
            num_scalar_prefetch=0,
            grid=(B, n_t),
            in_specs=[
                pl.BlockSpec((1, t_blk, d_in), lambda b, t: (b, t, 0)),
                pl.BlockSpec((d_in, d_out), lambda b, t: (0, 0)),
                pl.BlockSpec((d_in, d_out), lambda b, t: (0, 0)),
                pl.BlockSpec((d_in, d_out), lambda b, t: (0, 0)),
            ],
            out_specs=(qkv_spec, qkv_spec, qkv_spec),
        ),
        compiler_params=pltpu.CompilerParams(
            dimension_semantics=("parallel", "parallel")),
    )(x_c, wq_t, wk_t, wv_t)

    # ---- stage 2: flash attention + fused output projection ----
    out_p = pl.pallas_call(
        _flash_attn_kernel,
        out_shape=jax.ShapeDtypeStruct((B, T_p, d_out_p), orig_dtype),
        grid_spec=pltpu.PrefetchScalarGridSpec(
            num_scalar_prefetch=0,
            grid=(B, n_t, n_t),
            in_specs=[
                pl.BlockSpec((1, num_heads, t_blk, head_dim),
                             lambda b, qi, ki: (b, 0, qi, 0)),
                pl.BlockSpec((1, num_heads, t_blk, head_dim),
                             lambda b, qi, ki: (b, 0, ki, 0)),
                pl.BlockSpec((1, num_heads, t_blk, head_dim),
                             lambda b, qi, ki: (b, 0, ki, 0)),
                pl.BlockSpec((d_out, d_out_p), lambda b, qi, ki: (0, 0)),
                pl.BlockSpec((1, d_out_p), lambda b, qi, ki: (0, 0)),
            ],
            out_specs=pl.BlockSpec((1, t_blk, d_out_p),
                                   lambda b, qi, ki: (b, qi, 0)),
            scratch_shapes=[
                pltpu.VMEM((num_heads, t_blk, 1), jnp.float32),        # m
                pltpu.VMEM((num_heads, t_blk, 1), jnp.float32),        # l
                pltpu.VMEM((num_heads, t_blk, head_dim), jnp.float32), # acc
            ],
        ),
        compiler_params=pltpu.CompilerParams(
            dimension_semantics=("parallel", "parallel", "arbitrary")),
    )(q, k, v, wo_t, bo_p)

    return out_p[:, :T, :d_out]


# ----------------------------------------------------------------------------
# Pure-JAX reference mirroring the PyTorch forward (eval mode)
# ----------------------------------------------------------------------------
def _reference(x, wq, wk, wv, wo, bo, *, num_heads):
    B, T, d_in = x.shape
    d_out = wq.shape[0]
    hd = d_out // num_heads
    q = x @ wq.T
    k = x @ wk.T
    v = x @ wv.T
    q = q.reshape(B, T, num_heads, hd).transpose(0, 2, 1, 3)
    k = k.reshape(B, T, num_heads, hd).transpose(0, 2, 1, 3)
    v = v.reshape(B, T, num_heads, hd).transpose(0, 2, 1, 3)
    scores = jnp.einsum('bhtd,bhsd->bhts', q, k)
    mask = jnp.triu(jnp.ones((T, T), dtype=bool), k=1)
    scores = jnp.where(mask, -jnp.inf, scores)
    attn = jax.nn.softmax(scores / math.sqrt(hd), axis=-1)
    ctx = jnp.einsum('bhts,bhsd->bhtd', attn, v)
    ctx = ctx.transpose(0, 2, 1, 3).reshape(B, T, d_out)
    return ctx @ wo.T + bo


if __name__ == "__main__":
    B, T, d_in = 2, 8, 32
    d_out, num_heads = 32, 4
    dropout = 0.0  # inference-mode dropout (identity)

    key = jax.random.PRNGKey(0)
    kx, kq, kk, kv, ko, kb = jax.random.split(key, 6)

    x = jax.random.normal(kx, (B, T, d_in), dtype=jnp.float32)

    # PyTorch nn.Linear default init: U(-1/sqrt(fan_in), 1/sqrt(fan_in))
    def linear_w(k, fan_out, fan_in):
        bound = 1.0 / math.sqrt(fan_in)
        return jax.random.uniform(k, (fan_out, fan_in), jnp.float32,
                                  minval=-bound, maxval=bound)

    wq = linear_w(kq, d_out, d_in)   # qkv_bias=False
    wk = linear_w(kk, d_out, d_in)
    wv = linear_w(kv, d_out, d_in)
    wo = linear_w(ko, d_out, d_out)
    bo = jax.random.uniform(kb, (d_out,), jnp.float32,
                            minval=-1.0 / math.sqrt(d_out),
                            maxval=1.0 / math.sqrt(d_out))

    ref = _reference(x, wq, wk, wv, wo, bo, num_heads=num_heads)

    # f32 MXU operands: tight correctness check.
    out_f32 = multi_head_attention(x, wq, wk, wv, wo, bo, num_heads=num_heads,
                                   compute_dtype=jnp.float32)
    out_f32 = jax.block_until_ready(out_f32)
    assert out_f32.shape == (B, T, d_out)
    assert jnp.allclose(out_f32, ref, atol=1e-4, rtol=1e-4), \
        float(jnp.max(jnp.abs(out_f32 - ref)))

    # bf16 MXU operands / f32 accumulation (fast path on v6e/v7x): looser tolerance.
    out_bf16 = multi_head_attention(x, wq, wk, wv, wo, bo, num_heads=num_heads,
                                    compute_dtype=jnp.bfloat16)
    out_bf16 = jax.block_until_ready(out_bf16)
    assert out_bf16.shape == (B, T, d_out)
    assert jnp.allclose(out_bf16, ref, atol=5e-2, rtol=5e-2), \
        float(jnp.max(jnp.abs(out_bf16 - ref)))

    print("KERNEL_OK")
</pallas_src>

<mosaic_0001>
module attributes {stable_mosaic.version = 11 : i64} {
  func.func @_qkv_proj_kernel(%arg0: i32, %arg1: i32, %arg2: memref<1x8x32xf32, #tpu.memory_space<vmem>>, %arg3: memref<32x32xf32, #tpu.memory_space<vmem>>, %arg4: memref<32x32xf32, #tpu.memory_space<vmem>>, %arg5: memref<32x32xf32, #tpu.memory_space<vmem>>, %arg6: memref<1x4x8x8xf32, #tpu.memory_space<vmem>>, %arg7: memref<1x4x8x8xf32, #tpu.memory_space<vmem>>, %arg8: memref<1x4x8x8xf32, #tpu.memory_space<vmem>>) attributes {dimension_semantics = [#tpu.dimension_semantics<parallel>, #tpu.dimension_semantics<parallel>], iteration_bounds = array<i64: 2, 1>, scalar_prefetch = 0 : i64, scratch_operands = 0 : i64, tpu.core_type = #tpu.core_type<tc>, window_params = [{transform_indices = @transform_0, window_bounds = array<i64: 1, 8, 32>}, {pipeline_mode = #tpu.pipeline_mode<synchronous>, transform_indices = @transform_1, window_bounds = array<i64: 32, 32>}, {pipeline_mode = #tpu.pipeline_mode<synchronous>, transform_indices = @transform_2, window_bounds = array<i64: 32, 32>}, {pipeline_mode = #tpu.pipeline_mode<synchronous>, transform_indices = @transform_3, window_bounds = array<i64: 32, 32>}, {transform_indices = @transform_4, window_bounds = array<i64: 1, 4, 8, 8>}, {transform_indices = @transform_5, window_bounds = array<i64: 1, 4, 8, 8>}, {transform_indices = @transform_6, window_bounds = array<i64: 1, 4, 8, 8>}]} {
    %c0 = arith.constant 0 : index
    %c0_0 = arith.constant 0 : index
    %c0_1 = arith.constant 0 : index
    %0 = vector.load %arg2[%c0, %c0_0, %c0_1] : memref<1x8x32xf32, #tpu.memory_space<vmem>>, vector<1x8x32xf32>
    %1 = vector.shape_cast %0 : vector<1x8x32xf32> to vector<8x32xf32>
    %c0_2 = arith.constant 0 : index
    %c0_3 = arith.constant 0 : index
    %2 = vector.load %arg3[%c0_2, %c0_3] : memref<32x32xf32, #tpu.memory_space<vmem>>, vector<32x32xf32>
    %cst = arith.constant dense<0.000000e+00> : vector<8x32xf32>
    %3 = tpu.matmul %1, %2, %cst {dimension_numbers = #tpu.dot_dimension_numbers<[1], [0], [0], [1], [0, 0, 1, 1], [], []>} : vector<8x32xf32>, vector<32x32xf32>, vector<8x32xf32> -> vector<8x32xf32>
    %4 = vector.extract_strided_slice %3 {offsets = [0, 0], sizes = [8, 8], strides = [1, 1]} : vector<8x32xf32> to vector<8x8xf32>
    %c0_4 = arith.constant 0 : index
    %c0_5 = arith.constant 0 : index
    %c0_6 = arith.constant 0 : index
    %c0_7 = arith.constant 0 : index
    %5 = vector.load %arg6[%c0_4, %c0_5, %c0_6, %c0_7] : memref<1x4x8x8xf32, #tpu.memory_space<vmem>>, vector<1x1x8x8xf32>
    %6 = vector.shape_cast %5 : vector<1x1x8x8xf32> to vector<8x8xf32>
    %7 = vector.shape_cast %4 : vector<8x8xf32> to vector<1x1x8x8xf32>
    tpu.vector_store %arg6[%c0_4, %c0_5, %c0_6, %c0_7], %7 {strides = array<i32>} : memref<1x4x8x8xf32, #tpu.memory_space<vmem>>, vector<1x1x8x8xf32>,
    %8 = vector.extract_strided_slice %3 {offsets = [0, 8], sizes = [8, 8], strides = [1, 1]} : vector<8x32xf32> to vector<8x8xf32>
    %c0_8 = arith.constant 0 : index
    %c1 = arith.constant 1 : index
    %c0_9 = arith.constant 0 : index
    %c0_10 = arith.constant 0 : index
    %9 = vector.load %arg6[%c0_8, %c1, %c0_9, %c0_10] : memref<1x4x8x8xf32, #tpu.memory_space<vmem>>, vector<1x1x8x8xf32>
    %10 = vector.shape_cast %9 : vector<1x1x8x8xf32> to vector<8x8xf32>
    %11 = vector.shape_cast %8 : vector<8x8xf32> to vector<1x1x8x8xf32>
    tpu.vector_store %arg6[%c0_8, %c1, %c0_9, %c0_10], %11 {strides = array<i32>} : memref<1x4x8x8xf32, #tpu.memory_space<vmem>>, vector<1x1x8x8xf32>,
    %12 = vector.extract_strided_slice %3 {offsets = [0, 16], sizes = [8, 8], strides = [1, 1]} : vector<8x32xf32> to vector<8x8xf32>
    %c0_11 = arith.constant 0 : index
    %c2 = arith.constant 2 : index
    %c0_12 = arith.constant 0 : index
    %c0_13 = arith.constant 0 : index
    %13 = vector.load %arg6[%c0_11, %c2, %c0_12, %c0_13] : memref<1x4x8x8xf32, #tpu.memory_space<vmem>>, vector<1x1x8x8xf32>
    %14 = vector.shape_cast %13 : vector<1x1x8x8xf32> to vector<8x8xf32>
    %15 = vector.shape_cast %12 : vector<8x8xf32> to vector<1x1x8x8xf32>
    tpu.vector_store %arg6[%c0_11, %c2, %c0_12, %c0_13], %15 {strides = array<i32>} : memref<1x4x8x8xf32, #tpu.memory_space<vmem>>, vector<1x1x8x8xf32>,
    %16 = vector.extract_strided_slice %3 {offsets = [0, 24], sizes = [8, 8], strides = [1, 1]} : vector<8x32xf32> to vector<8x8xf32>
    %c0_14 = arith.constant 0 : index
    %c3 = arith.constant 3 : index
    %c0_15 = arith.constant 0 : index
    %c0_16 = arith.constant 0 : index
    %17 = vector.load %arg6[%c0_14, %c3, %c0_15, %c0_16] : memref<1x4x8x8xf32, #tpu.memory_space<vmem>>, vector<1x1x8x8xf32>
    %18 = vector.shape_cast %17 : vector<1x1x8x8xf32> to vector<8x8xf32>
    %19 = vector.shape_cast %16 : vector<8x8xf32> to vector<1x1x8x8xf32>
    tpu.vector_store %arg6[%c0_14, %c3, %c0_15, %c0_16], %19 {strides = array<i32>} : memref<1x4x8x8xf32, #tpu.memory_space<vmem>>, vector<1x1x8x8xf32>,
    %c0_17 = arith.constant 0 : index
    %c0_18 = arith.constant 0 : index
    %20 = vector.load %arg4[%c0_17, %c0_18] : memref<32x32xf32, #tpu.memory_space<vmem>>, vector<32x32xf32>
    %cst_19 = arith.constant dense<0.000000e+00> : vector<8x32xf32>
    %21 = tpu.matmul %1, %20, %cst_19 {dimension_numbers = #tpu.dot_dimension_numbers<[1], [0], [0], [1], [0, 0, 1, 1], [], []>} : vector<8x32xf32>, vector<32x32xf32>, vector<8x32xf32> -> vector<8x32xf32>
    %22 = vector.extract_strided_slice %21 {offsets = [0, 0], sizes = [8, 8], strides = [1, 1]} : vector<8x32xf32> to vector<8x8xf32>
    %c0_20 = arith.constant 0 : index
    %c0_21 = arith.constant 0 : index
    %c0_22 = arith.constant 0 : index
    %c0_23 = arith.constant 0 : index
    %23 = vector.load %arg7[%c0_20, %c0_21, %c0_22, %c0_23] : memref<1x4x8x8xf32, #tpu.memory_space<vmem>>, vector<1x1x8x8xf32>
    %24 = vector.shape_cast %23 : vector<1x1x8x8xf32> to vector<8x8xf32>
    %25 = vector.shape_cast %22 : vector<8x8xf32> to vector<1x1x8x8xf32>
    tpu.vector_store %arg7[%c0_20, %c0_21, %c0_22, %c0_23], %25 {strides = array<i32>} : memref<1x4x8x8xf32, #tpu.memory_space<vmem>>, vector<1x1x8x8xf32>,
    %26 = vector.extract_strided_slice %21 {offsets = [0, 8], sizes = [8, 8], strides = [1, 1]} : vector<8x32xf32> to vector<8x8xf32>
    %c0_24 = arith.constant 0 : index
    %c1_25 = arith.constant 1 : index
    %c0_26 = arith.constant 0 : index
    %c0_27 = arith.constant 0 : index
    %27 = vector.load %arg7[%c0_24, %c1_25, %c0_26, %c0_27] : memref<1x4x8x8xf32, #tpu.memory_space<vmem>>, vector<1x1x8x8xf32>
    %28 = vector.shape_cast %27 : vector<1x1x8x8xf32> to vector<8x8xf32>
    %29 = vector.shape_cast %26 : vector<8x8xf32> to vector<1x1x8x8xf32>
    tpu.vector_store %arg7[%c0_24, %c1_25, %c0_26, %c0_27], %29 {strides = array<i32>} : memref<1x4x8x8xf32, #tpu.memory_space<vmem>>, vector<1x1x8x8xf32>,
    %30 = vector.extract_strided_slice %21 {offsets = [0, 16], sizes = [8, 8], strides = [1, 1]} : vector<8x32xf32> to vector<8x8xf32>
    %c0_28 = arith.constant 0 : index
    %c2_29 = arith.constant 2 : index
    %c0_30 = arith.constant 0 : index
    %c0_31 = arith.constant 0 : index
    %31 = vector.load %arg7[%c0_28, %c2_29, %c0_30, %c0_31] : memref<1x4x8x8xf32, #tpu.memory_space<vmem>>, vector<1x1x8x8xf32>
    %32 = vector.shape_cast %31 : vector<1x1x8x8xf32> to vector<8x8xf32>
    %33 = vector.shape_cast %30 : vector<8x8xf32> to vector<1x1x8x8xf32>
    tpu.vector_store %arg7[%c0_28, %c2_29, %c0_30, %c0_31], %33 {strides = array<i32>} : memref<1x4x8x8xf32, #tpu.memory_space<vmem>>, vector<1x1x8x8xf32>,
    %34 = vector.extract_strided_slice %21 {offsets = [0, 24], sizes = [8, 8], strides = [1, 1]} : vector<8x32xf32> to vector<8x8xf32>
    %c0_32 = arith.constant 0 : index
    %c3_33 = arith.constant 3 : index
    %c0_34 = arith.constant 0 : index
    %c0_35 = arith.constant 0 : index
    %35 = vector.load %arg7[%c0_32, %c3_33, %c0_34, %c0_35] : memref<1x4x8x8xf32, #tpu.memory_space<vmem>>, vector<1x1x8x8xf32>
    %36 = vector.shape_cast %35 : vector<1x1x8x8xf32> to vector<8x8xf32>
    %37 = vector.shape_cast %34 : vector<8x8xf32> to vector<1x1x8x8xf32>
    tpu.vector_store %arg7[%c0_32, %c3_33, %c0_34, %c0_35], %37 {strides = array<i32>} : memref<1x4x8x8xf32, #tpu.memory_space<vmem>>, vector<1x1x8x8xf32>,
    %c0_36 = arith.constant 0 : index
    %c0_37 = arith.constant 0 : index
    %38 = vector.load %arg5[%c0_36, %c0_37] : memref<32x32xf32, #tpu.memory_space<vmem>>, vector<32x32xf32>
    %cst_38 = arith.constant dense<0.000000e+00> : vector<8x32xf32>
    %39 = tpu.matmul %1, %38, %cst_38 {dimension_numbers = #tpu.dot_dimension_numbers<[1], [0], [0], [1], [0, 0, 1, 1], [], []>} : vector<8x32xf32>, vector<32x32xf32>, vector<8x32xf32> -> vector<8x32xf32>
    %40 = vector.extract_strided_slice %39 {offsets = [0, 0], sizes = [8, 8], strides = [1, 1]} : vector<8x32xf32> to vector<8x8xf32>
    %c0_39 = arith.constant 0 : index
    %c0_40 = arith.constant 0 : index
    %c0_41 = arith.constant 0 : index
    %c0_42 = arith.constant 0 : index
    %41 = vector.load %arg8[%c0_39, %c0_40, %c0_41, %c0_42] : memref<1x4x8x8xf32, #tpu.memory_space<vmem>>, vector<1x1x8x8xf32>
    %42 = vector.shape_cast %41 : vector<1x1x8x8xf32> to vector<8x8xf32>
    %43 = vector.shape_cast %40 : vector<8x8xf32> to vector<1x1x8x8xf32>
    tpu.vector_store %arg8[%c0_39, %c0_40, %c0_41, %c0_42], %43 {strides = array<i32>} : memref<1x4x8x8xf32, #tpu.memory_space<vmem>>, vector<1x1x8x8xf32>,
    %44 = vector.extract_strided_slice %39 {offsets = [0, 8], sizes = [8, 8], strides = [1, 1]} : vector<8x32xf32> to vector<8x8xf32>
    %c0_43 = arith.constant 0 : index
    %c1_44 = arith.constant 1 : index
    %c0_45 = arith.constant 0 : index
    %c0_46 = arith.constant 0 : index
    %45 = vector.load %arg8[%c0_43, %c1_44, %c0_45, %c0_46] : memref<1x4x8x8xf32, #tpu.memory_space<vmem>>, vector<1x1x8x8xf32>
    %46 = vector.shape_cast %45 : vector<1x1x8x8xf32> to vector<8x8xf32>
    %47 = vector.shape_cast %44 : vector<8x8xf32> to vector<1x1x8x8xf32>
    tpu.vector_store %arg8[%c0_43, %c1_44, %c0_45, %c0_46], %47 {strides = array<i32>} : memref<1x4x8x8xf32, #tpu.memory_space<vmem>>, vector<1x1x8x8xf32>,
    %48 = vector.extract_strided_slice %39 {offsets = [0, 16], sizes = [8, 8], strides = [1, 1]} : vector<8x32xf32> to vector<8x8xf32>
    %c0_47 = arith.constant 0 : index
    %c2_48 = arith.constant 2 : index
    %c0_49 = arith.constant 0 : index
    %c0_50 = arith.constant 0 : index
    %49 = vector.load %arg8[%c0_47, %c2_48, %c0_49, %c0_50] : memref<1x4x8x8xf32, #tpu.memory_space<vmem>>, vector<1x1x8x8xf32>
    %50 = vector.shape_cast %49 : vector<1x1x8x8xf32> to vector<8x8xf32>
    %51 = vector.shape_cast %48 : vector<8x8xf32> to vector<1x1x8x8xf32>
    tpu.vector_store %arg8[%c0_47, %c2_48, %c0_49, %c0_50], %51 {strides = array<i32>} : memref<1x4x8x8xf32, #tpu.memory_space<vmem>>, vector<1x1x8x8xf32>,
    %52 = vector.extract_strided_slice %39 {offsets = [0, 24], sizes = [8, 8], strides = [1, 1]} : vector<8x32xf32> to vector<8x8xf32>
    %c0_51 = arith.constant 0 : index
    %c3_52 = arith.constant 3 : index
    %c0_53 = arith.constant 0 : index
    %c0_54 = arith.constant 0 : index
    %53 = vector.load %arg8[%c0_51, %c3_52, %c0_53, %c0_54] : memref<1x4x8x8xf32, #tpu.memory_space<vmem>>, vector<1x1x8x8xf32>
    %54 = vector.shape_cast %53 : vector<1x1x8x8xf32> to vector<8x8xf32>
    %55 = vector.shape_cast %52 : vector<8x8xf32> to vector<1x1x8x8xf32>
    tpu.vector_store %arg8[%c0_51, %c3_52, %c0_53, %c0_54], %55 {strides = array<i32>} : memref<1x4x8x8xf32, #tpu.memory_space<vmem>>, vector<1x1x8x8xf32>,
    return
  }
  func.func @transform_0(%arg0: i32, %arg1: i32) -> (i32, i32, i32) {
    %c0_i32 = arith.constant 0 : i32
    %c0_i32_0 = arith.constant 0 : i32
    return %arg0, %arg1, %c0_i32 : i32, i32, i32
  }
  func.func @transform_1(%arg0: i32, %arg1: i32) -> (i32, i32) {
    %c0_i32 = arith.constant 0 : i32
    %c0_i32_0 = arith.constant 0 : i32
    %c0_i32_1 = arith.constant 0 : i32
    return %c0_i32, %c0_i32_0 : i32, i32
  }
  func.func @transform_2(%arg0: i32, %arg1: i32) -> (i32, i32) {
    %c0_i32 = arith.constant 0 : i32
    %c0_i32_0 = arith.constant 0 : i32
    %c0_i32_1 = arith.constant 0 : i32
    return %c0_i32, %c0_i32_0 : i32, i32
  }
  func.func @transform_3(%arg0: i32, %arg1: i32) -> (i32, i32) {
    %c0_i32 = arith.constant 0 : i32
    %c0_i32_0 = arith.constant 0 : i32
    %c0_i32_1 = arith.constant 0 : i32
    return %c0_i32, %c0_i32_0 : i32, i32
  }
  func.func @transform_4(%arg0: i32, %arg1: i32) -> (i32, i32, i32, i32) {
    %c0_i32 = arith.constant 0 : i32
    %c0_i32_0 = arith.constant 0 : i32
    %c0_i32_1 = arith.constant 0 : i32
    return %arg0, %c0_i32, %arg1, %c0_i32_0 : i32, i32, i32, i32
  }
  func.func @transform_5(%arg0: i32, %arg1: i32) -> (i32, i32, i32, i32) {
    %c0_i32 = arith.constant 0 : i32
    %c0_i32_0 = arith.constant 0 : i32
    %c0_i32_1 = arith.constant 0 : i32
    return %arg0, %c0_i32, %arg1, %c0_i32_0 : i32, i32, i32, i32
  }
  func.func @transform_6(%arg0: i32, %arg1: i32) -> (i32, i32, i32, i32) {
    %c0_i32 = arith.constant 0 : i32
    %c0_i32_0 = arith.constant 0 : i32
    %c0_i32_1 = arith.constant 0 : i32
    return %arg0, %c0_i32, %arg1, %c0_i32_0 : i32, i32, i32, i32
  }
}

</mosaic_0001>

<bundles_post_ra>
// kernel: tpu_custom_call.1
= control target key start
LH: loop header
LB: loop body
LE: loop exit
PB: predicated region body
PF: predicated region fallthrough
CT: control target
= control target key end

     0   :  { %12 = vsyncpa [#allocation3], 0  ;;  %s1807_s0 = inlined_call_operand.hbm [shape: f32[2,8,32], index: 0, kind: input, shape index: {}]   ;;  %s1808_s1 = inlined_call_operand.hbm [shape: f32[32,32], index: 1, kind: input, shape index: {}]   ;;  %s1809_s2 = inlined_call_operand.hbm [shape: f32[32,32], index: 2, kind: input, shape index: {}]   ;;  %s1810_s3 = inlined_call_operand.hbm [shape: f32[32,32], index: 3, kind: input, shape index: {}]   ;;  %s1811_s4 = inlined_call_operand.hbm [shape: f32[2,4,8,8], index: 4, kind: output, shape index: {0}]   ;;  %s1812_s5 = inlined_call_operand.hbm [shape: f32[2,4,8,8], index: 5, kind: output, shape index: {1}]   ;;  %s1813_s6 = inlined_call_operand.hbm [shape: f32[2,4,8,8], index: 6, kind: output, shape index: {2}]  }
   0x1   :  { %14 = vsyncpa [#allocation3 + $0x1], 0 }
   0x2   :  { %15 = vsyncpa [#allocation6], 0 }
   0x3   :  { %16 = vsyncpa [#allocation9], 0 }
   0x4   :  { %17 = vsyncpa [#allocation4], 0 }
   0x5   :  { %19 = vsyncpa [#allocation4 + $0x1], 0 }
   0x6   :  { %20 = vsyncpa [#allocation12], 0 }
   0x7   :  { %22 = vsyncpa [#allocation12 + $0x1], 0  ;;  %s1406_s21 = smov 0   ;;  %s1408_s22 = smov 0  }
   0x8   :  { %s1410_s23 = smov 0   ;;  %s1412_s24 = smov 0  }
   0x9   :  { %s1414_s25 = smov 0   ;;  %s1416_s26 = smov 0  }
   0xa LB: > { %1820 = sst [smem:[#allocation19_spill]] %s1332_s21  ;;  %s1437_s27 = sadd.s32 4294967295, %s1352_s26   ;;  %s1352_s26 = sphi %s1416_s26, %s28_s26   ;;  %s1348_s25 = sphi %s1414_s25, %s1845_s25   ;;  %s1344_s24 = sphi %s1412_s24, %s1844_s24   ;;  %s1340_s23 = sphi %s1410_s23, %s1843_s23   ;;  %s1336_s22 = sphi %s1408_s22, %s1842_s22   ;;  %s1332_s21 = sphi %s1406_s21, %s1841_s21  }
   0xb   : > { %s1815_s28 = sadd.s32 4294967294, %s1352_s26   ;;  %p62_p0 = scmp.ne.s32.totalorder %s1336_s22, %s1332_s21 }
   0xc   : > { %p1814_p1 = scmp.eq.s32.totalorder %s1437_s27, 0  ;;  %p157_p3 = scmp.eq.s32.totalorder %s1815_s28, 1 }
   0xd   : > { %p868_p5 = scmp.ge.s32.totalorder %s1352_s26, 1  ;;  %p220_p7 = scmp.lt.s32.totalorder %s1352_s26, 3 }
   0xe   : > { %p1448_p4 = por %p1814_p1, %p62_p0  ;;  %p1453_p6 = por %p157_p3, %p62_p0 }
   0xf   : > { %p1458_p8 = pnand %p868_p5, %p220_p7  ;;  %s1354_s8 = smov [#allocation5]  }
  0x10   : > { %s1821_s29 = scalar_select %p1448_p4, 1, 0 }
  0x11   : > { %s1822_s30 = scalar_select %p1453_p6, 1, 0 }
  0x12   : > { %s1824_s7 = scalar_select %p1458_p8, 1, 0 }
  0x13   : > { %1823 = sst [smem:[#allocation20_spill]] %s1822_s30  ;;  %s232_s9 = sshll.u32 %s1354_s8, 4  ;;  %s1462_s9 = int_to_ptr.vmem [resolvable:$true] %s232_s9 }
  0x14   : > { %p995_p9 = pneg %p1458_p8  ;;  %s1355_s11 = smov [#allocation7]  }
  0x15   : > { %s245_s12 = sshll.u32 %s1355_s11, 4  ;;  %s1356_s13 = smov [#allocation8]   ;;  %s1473_s12 = int_to_ptr.vmem [resolvable:$true] %s245_s12 }
  0x16   : > { %p1469_p11 = pnand %p995_p9, %p1814_p1  ;;  %s1475_s14 = sshll.u32 %s1356_s13, 4  ;;  %s259_s14 = int_to_ptr.vmem [resolvable:$true] %s1475_s14 }
  0x17   : > { %s1088_s17 = scalar_lea.hbm %s1808_s1, 512 }
  0x18   : > { %p1089_p12 = scmp.ne.s32.totalorder %s1808_s1, %s1088_s17  ;;  %p1485_p13 = pneg %p1469_p11 }
  0x19   : > { %p1095_p5 = scmp.lt.u32.totalorder %s1088_s17, %s1808_s1 }
  0x1a   : > { %p1091_p0 = pnand %p1485_p13, %p1089_p12 }
  0x1c   : > { %p1092_p3 = pneg %p1091_p0 }
  0x1e   : > { %p1097_p7 = pnand %p1095_p5, %p1092_p3 }
  0x20   : > { %1100 = shalt.err (!%p1097_p7)
}
  0x21   : > { %s1101_s13 = scalar_lea.vmem %s1462_s9, 512  ;;  %p1109_p2 = scmp.lt.s32.totalorder %s1462_s9, %s1462_s9 }
  0x22   : > { %p1102_p9 = scmp.ne.s32.totalorder %s1462_s9, %s1101_s13  ;;  %p1110_p6 = scmp.lt.s32.totalorder %s1101_s13, %s1101_s13 }
  0x24   : > { %p1104_p10 = pnand %p1102_p9, %p1485_p13  ;;  %p1111_p12 = por %p1110_p6, %p1109_p2 }
  0x26   : > { %p1105_p1 = pneg %p1104_p10 }
  0x28   : > { %p1112_p0 = pnand %p1111_p12, %p1105_p1 }
  0x2a   : > { %1115 = shalt.err (!%p1112_p0)
}
  0x2b   : > { %s1357_s15 = smov 128   ;;  %s1358_s16 = smov 8  }
  0x2c   : > { %998 = dma.hbm_to_vmem [thread:$0]  (!%p1469_p11), %s1808_s1, 512, %s1462_s9, [#allocation6], %s1357_s15, %s1357_s15, %s1358_s16  }
  0x2d   : > { %s1116_s11 = scalar_lea.hbm %s1809_s2, 512 }
  0x2e   : > { %p1117_p1 = scmp.ne.s32.totalorder %s1809_s2, %s1116_s11  ;;  %p1123_p10 = scmp.lt.u32.totalorder %s1116_s11, %s1809_s2 }
  0x30   : > { %p1119_p2 = pnand %p1117_p1, %p1485_p13 }
  0x32   : > { %p1120_p6 = pneg %p1119_p2 }
  0x34   : > { %p1125_p3 = pnand %p1123_p10, %p1120_p6 }
  0x36   : > { %1128 = shalt.err (!%p1125_p3)
}
  0x37   : > { %s1129_s9 = scalar_lea.vmem %s1473_s12, 512  ;;  %p1137_p12 = scmp.lt.s32.totalorder %s1473_s12, %s1473_s12 }
  0x38   : > { %p1130_p5 = scmp.ne.s32.totalorder %s1473_s12, %s1129_s9  ;;  %p1138_p0 = scmp.lt.s32.totalorder %s1129_s9, %s1129_s9 }
  0x3a   : > { %p1132_p7 = pnand %p1130_p5, %p1485_p13  ;;  %p1139_p1 = por %p1138_p0, %p1137_p12 }
  0x3c   : > { %p1133_p9 = pneg %p1132_p7 }
  0x3e   : > { %p1140_p2 = pnand %p1139_p1, %p1133_p9 }
  0x40   : > { %1143 = shalt.err (!%p1140_p2)
}
  0x41   : > { %1001 = dma.hbm_to_vmem [thread:$0]  (!%p1469_p11), %s1809_s2, 512, %s1473_s12, [#allocation6], %s1357_s15, %s1357_s15, %s1358_s16  }
  0x42   : > { %s1144_s18 = scalar_lea.hbm %s1810_s3, 512 }
  0x43   : > { %p1145_p6 = scmp.ne.s32.totalorder %s1810_s3, %s1144_s18  ;;  %p1151_p5 = scmp.lt.u32.totalorder %s1144_s18, %s1810_s3 }
  0x45   : > { %p1147_p10 = pnand %p1145_p6, %p1485_p13 }
  0x47   : > { %p1148_p3 = pneg %p1147_p10 }
  0x49   : > { %p1153_p7 = pnand %p1151_p5, %p1148_p3 }
  0x4b   : > { %1156 = shalt.err (!%p1153_p7)
}
  0x4c   : > { %s1157_s9 = scalar_lea.vmem %s259_s14, 512  ;;  %p1165_p1 = scmp.lt.s32.totalorder %s259_s14, %s259_s14 }
  0x4d   : > { %p1158_p9 = scmp.ne.s32.totalorder %s259_s14, %s1157_s9  ;;  %p1166_p2 = scmp.lt.s32.totalorder %s1157_s9, %s1157_s9 }
  0x4f   : > { %p1160_p12 = pnand %p1158_p9, %p1485_p13  ;;  %p1167_p4 = por %p1166_p2, %p1165_p1 }
  0x51   : > { %p1161_p0 = pneg %p1160_p12 }
  0x53   : > { %p1168_p8 = pnand %p1167_p4, %p1161_p0 }
  0x55   : > { %1171 = shalt.err (!%p1168_p8)
}
  0x56   : > { %1004 = dma.hbm_to_vmem [thread:$0]  (!%p1469_p11), %s1810_s3, 512, %s259_s14, [#allocation9], %s1357_s15, %s1357_s15, %s1358_s16  }
  0x57   : > { %s49_s20 = sadd.s32 1, %s1340_s23  ;;  %s40_s10 = sadd.s32 1, %s1348_s25 }
  0x58   : > { %p56_p4 = scmp.ne.s32.totalorder %s1340_s23, %s1336_s22  ;;  %p42_p8 = scmp.ge.s32.totalorder %s40_s10, 2 }
  0x59   : > { %p57_p13 = scmp.eq.s32.totalorder %s1352_s26, 0  ;;  %p1827_p6 = scmp.eq.s32.totalorder %s1437_s27, 1 }
  0x5a   : > { %p1022_p3 = scmp.lt.s32.totalorder %s1352_s26, 2  ;;  %s1847_s10 = smov (%p42_p8, %s40_s10), 0 }
  0x5b   : > { %p1564_p10 = por %p1827_p6, %p56_p4  ;;  %p58_p5 = por %p57_p13, %p56_p4 }
  0x5c   : > { %s272_s30 = sand.u32 1, %s1340_s23   ;;  %s44_s17 = ssub.s32 %s1348_s25, %s1847_s10 }
  0x5d   : > { %p47_p7 = scmp.eq.s32.totalorder %s44_s17, 0  ;;  %s873_s14 = sshll.u32 %s272_s30, 3 }
  0x5e   : > { %s874_s15 = sshll.u32 %s1348_s25, 7  ;;  %s276_s11 = scalar_lea.vmem [#allocation2], %s873_s14 }
  0x5f   : > { %s1576_s16 = scalar_select %p47_p7, %s1340_s23, %s49_s20  }
  0x60   : > { %s1581_s8 = scalar_lea.hbm %s1807_s0, %s874_s15  ;;  %s284_s13 = sshll.u32 %s276_s11, 4  ;;  %s1583_s13 = int_to_ptr.vmem [resolvable:$true] %s284_s13 }
  0x61   : > { %p1587_p11 = pnand %p1022_p3, %p58_p5  ;;  %s273_s12 = scalar_lea.sflag [#allocation3], %s272_s30 }
  0x62   : > { %s1172_s21 = scalar_lea.hbm %s1581_s8, 128  ;;  %s1177_s14 = scalar_lea.hbm %s1807_s0, 256 }
  0x63   : > { %p1173_p9 = scmp.ne.s32.totalorder %s1581_s8, %s1172_s21  ;;  %p1174_p12 = pneg %p1587_p11 }
  0x64   : > { %p1178_p2 = scmp.lt.u32.totalorder %s1581_s8, %s1807_s0  ;;  %p1179_p4 = scmp.lt.u32.totalorder %s1177_s14, %s1172_s21 }
  0x65   : > { %p1175_p0 = pnand %p1174_p12, %p1173_p9  ;;  %p1181_p13 = scmp.lt.u32.totalorder %s1172_s21, %s1581_s8 }
  0x66   : > { %p1180_p8 = por %p1179_p4, %p1178_p2 }
  0x67   : > { %p1176_p1 = pneg %p1175_p0 }
  0x68   : > { %p1182_p6 = por %p1181_p13, %p1180_p8 }
  0x6a   : > { %p1183_p3 = pnand %p1182_p6, %p1176_p1 }
  0x6c   : > { %1186 = shalt.err (!%p1183_p3)
}
  0x6d   : > { %s1187_s30 = scalar_lea.vmem %s1583_s13, 128  ;;  %s1359_s19 = smov [#allocation2]  }
  0x6e   : > { %p1188_p5 = scmp.ne.s32.totalorder %s1583_s13, %s1187_s30  ;;  %s1192_s11 = sshll.u32 %s1359_s19, 4  ;;  %s1193_s11 = int_to_ptr.vmem [resolvable:$false] %s1192_s11 }
  0x6f   : > { %s1194_s20 = scalar_lea.vmem %s1193_s11, 256  ;;  %p1195_p0 = scmp.lt.s32.totalorder %s1583_s13, %s1193_s11 }
  0x70   : > { %p1190_p7 = pnand %p1188_p5, %p1174_p12  ;;  %p1196_p2 = scmp.lt.s32.totalorder %s1194_s20, %s1187_s30 }
  0x72   : > { %p1191_p9 = pneg %p1190_p7  ;;  %p1197_p4 = por %p1196_p2, %p1195_p0 }
  0x74   : > { %p1198_p8 = pnand %p1197_p4, %p1191_p9 }
  0x76   : > { %1201 = shalt.err (!%p1198_p8)
}
  0x77   : > { %1008 = dma.hbm_to_vmem [thread:$0]  (!%p1587_p11), %s1581_s8, 128, %s1583_s13, %s273_s12  }
  0x78   : > { %p1830_p1 = scmp.ne.s32.totalorder %s1824_s7, 0 }
  0x79   : > { %s1619_s21 = sand.u32 (!%p1830_p1), 1, %s1336_s22   ;;  %p1831_p12 = scmp.ne.s32.totalorder (!%p1830_p1), %s1821_s29, 0 }
  0x7a   : > { %293 = sbr.rel (%p1830_p1) target bundleno = 538 (0x21a), region = 36  ;;  %s876_s17 = sshll.u32 (!%p1830_p1), %s1619_s21, 3 }
  0x7b   : > { %s296_s14 = scalar_lea.sflag (!%p1830_p1), [#allocation3], %s1619_s21  ;;  %s1623_s15 = scalar_lea.vmem (!%p1830_p1), [#allocation2], %s876_s17 }
  0x81   : > { %1311 = dma.done.wait (%p1831_p12), %s296_s14, 128  }
  0x82   : > { %1313 = vsyncadd (%p1831_p12), %s296_s14, 4294967168  ;;  %p1832_p11 = scmp.eq.s32.totalorder %s1437_s27, 0 }
  0x84   : > { %1315 = dma.done.wait (%p1832_p11), [#allocation6], 1024   ;;  %p1833_p13 = pmov %p1832_p11 }
  0x85   : > { %p1834_p6 = pmov %p1832_p11 }
  0x86   : > { %1317 = vsyncadd (%p1833_p13), [#allocation6], 4294966272 }
  0x87   : > { %1319 = dma.done.wait (%p1834_p6), [#allocation9], 512   ;;  %p1835_p3 = pmov %p1834_p6 }
  0x88   : > { %v1360_v0 = vmov 0.0|0.0   ;;  %vm1361_vm0 = vmmov 0   ;;  %v1362_v1 = vmov 0.0   ;;  %v447_v2 = vld [vmem:[#allocation7] sm:$0xff]  ;;  %v448_v3 = vld [vmem:[#allocation7 + $0x8] sm:$0xff]  ;;  %v449_v7 = vld [vmem:[#allocation7 + $0x10] sm:$0xff] }
  0x89   : > { %1321 = vsyncadd (%p1835_p3), [#allocation9], 4294966784  ;;  %963 = vmatprep.subr.bf16.mxu1 %v1360_v0  ;;  %957 = vmatprep.subr.bf16.mxu0 %v1360_v0  ;;  %v351_v4 = vld [vmem:[#allocation5] sm:$0xff]  ;;  %v964_v5 = vpack.c.bf16 %v448_v3, %v447_v2  ;;  %v352_v6 = vld [vmem:[#allocation5 + $0x8] sm:$0xff]  ;;  %vm355_vm1 = vcmask 261120   ;;  %s880_s29 = sshll.u32 %s1619_s21, 5 }
  0x8a   : > { %943 = vmatprep.mubr.msk.f32.mxu1 %vm1361_vm0, %v1362_v1  ;;  %932 = vmatprep.mubr.msk.f32.mxu0 %vm1361_vm0, %v1362_v1  ;;  %v450_v8 = vld [vmem:[#allocation7 + $0x18] sm:$0xff]  ;;  %v958_v9 = vpack.c.bf16 %v352_v6, %v351_v4  ;;  %v353_v10 = vld [vmem:[#allocation5 + $0x10] sm:$0xff]  ;;  %v538_v14 = vld [vmem:[#allocation8] sm:$0xff]  ;;  %vm429_vm2 = vcmask 64512   ;;  %s1642_s7 = scalar_lea.vmem [#allocation11], %s880_s29  ;;  %s1363_s8 = smov 104  }
  0x8b   : > { %v354_v11 = vld [vmem:[#allocation5 + $0x18] sm:$0xff]  ;;  %965 = vmatpush3.bf16.msra.mxu1 %v964_v5  ;;  %v967_v12 = vpack.c.bf16 %v450_v8, %v449_v7  ;;  %v539_v15 = vld [vmem:[#allocation8 + $0x8] sm:$0xff]  ;;  %v540_v18 = vld [vmem:[#allocation8 + $0x10] sm:$0xff]  ;;  %s1364_s13 = smov 120   ;;  %s1646_s9 = scalar_lea.vmem [#allocation10], %s880_s29 }
  0x8c   : > { %959 = vmatpush3.bf16.msra.mxu0 %v958_v9  ;;  %966 = vmatprep.subr.bf16.mxu1 %v1360_v0  ;;  %v961_v13 = vpack.c.bf16 %v354_v11, %v353_v10  ;;  %v350_v16 = vld [vmem:[%s1623_s15] sm:$0xff]  ;;  %v970_v17 = vpack.c.bf16 %v539_v15, %v538_v14  ;;  %s1365_s12 = smov 112   ;;  %s1650_s18 = scalar_lea.vmem [#allocation13], %s880_s29 }
  0x8d   : > { %960 = vmatprep.subr.bf16.mxu0 %v1360_v0  ;;  %v541_v19 = vld [vmem:[#allocation8 + $0x18] sm:$0xff]  ;;  %s671_s30 = sshll.u32 %s1642_s7, 4  ;;  %s634_s19 = sand.u32 1, %s1437_s27   ;;  %s1659_s30 = int_to_ptr.vmem [resolvable:$true] %s671_s30 }
  0x8e   : > { %v973_v20 = vpack.c.bf16 %v541_v19, %v540_v18  ;;  %s1657_s11 = sshll.u32 %s1344_s24, 9  ;;  %s654_s20 = sshll.u32 %s1646_s9, 4  ;;  %s1672_s20 = int_to_ptr.vmem [resolvable:$true] %s654_s20 }
  0x8f   : > { %968 = vmatpush3.bf16.msra.mxu1 %v967_v12  ;;  %s1670_s27 = scalar_lea.hbm %s1812_s5, %s1657_s11  ;;  %s1678_s24 = scalar_lea.sflag [#allocation12], %s634_s19 }
  0x90   : > { %962 = vmatpush3.bf16.msra.mxu0 %v961_v13  ;;  %s1202_s15 = scalar_lea.vmem %s1659_s30, 512  ;;  %s1366_s29 = smov [#allocation11]  }
  0x91   : > { %969 = vmatprep.subr.bf16.mxu0 %v1360_v0  ;;  %p1203_p5 = scmp.ne.s32.totalorder %s1659_s30, %s1202_s15 }
  0x92   : > { %944 = vmatmul.mubr.msk.f32.vlgmr.msra.gmra.mrb[0].mxu1 %vm355_vm1, %v350_v16 }
  0x93   : > { %933 = vmatmul.mubr.msk.f32.vlgmr.msra.gmra.mrb[0].mxu0 %vm355_vm1, %v350_v16  ;;  %p1204_p7 = pnand %p1203_p5, %p1564_p10 }
  0x94   : > { %971 = vmatpush3.bf16.msra.mxu0 %v970_v17  ;;  %954 = vmatprep.mubr.msk.f32.mxu0 %vm1361_vm0, %v1362_v1 }
  0x95   : > { %972 = vmatprep.subr.bf16.mxu0 %v1360_v0  ;;  %p1205_p9 = pneg %p1204_p7 }
  0x98   : > { %974 = vmatpush3.bf16.msra.mxu0 %v973_v20 }
  0x9b   : > { %955 = vmatmul.mubr.msk.f32.vlgmr.msra.gmra.mrb[2].mxu0 %vm355_vm1, %v350_v16 }
 0x165   : > { %v517_v21 = vpop.f32.mrb[0].mxu1 }
 0x166   : > { %521 = vst.msk [vmem:[%s1642_s7] sm:$0xff] %vm429_vm2, %v517_v21  ;;  %533 = vrot.lane.b32.xlu1 %v517_v21, %s1363_s8  ;;  %523 = vrot.lane.b32.xlu0 %v517_v21, %s1364_s13  ;;  %v945_v22 = vpop.f32.mrb[1].mxu1  ;;  %v425_v23 = vpop.f32.mrb[0].mxu0 }
 0x167   : > { %430 = vst.msk [vmem:[%s1646_s9] sm:$0xff] %vm429_vm2, %v425_v23  ;;  %v934_v24 = vpop.f32.mrb[1].mxu0 }
 0x16a   : > { %528 = vrot.lane.b32.xlu0 %v517_v21, %s1365_s12  ;;  %432 = vrot.lane.b32.xlu1 %v425_v23, %s1364_s13 }
 0x16e   : > { %437 = vrot.lane.b32.xlu0 %v425_v23, %s1365_s12  ;;  %442 = vrot.lane.b32.xlu1 %v425_v23, %s1363_s8  ;;  %v608_v25 = vpop.f32.mrb[2].mxu0 }
 0x16f   : > { %612 = vst.msk [vmem:[%s1650_s18] sm:$0xff] %vm429_vm2, %v608_v25  ;;  %v956_v26 = vpop.f32.mrb[3].mxu0 }
 0x172   : > { %619 = vrot.lane.b32.xlu1 %v608_v25, %s1365_s12  ;;  %614 = vrot.lane.b32.xlu0 %v608_v25, %s1364_s13 }
 0x176   : > { %624 = vrot.lane.b32.xlu0 %v608_v25, %s1363_s8  ;;  %s1206_s8 = sshll.u32 %s1366_s29, 4  ;;  %s1207_s8 = int_to_ptr.vmem [resolvable:$false] %s1206_s8 }
 0x177   : > { %s1208_s13 = scalar_lea.vmem %s1207_s8, 1024  ;;  %p1209_p0 = scmp.lt.s32.totalorder %s1659_s30, %s1207_s8 }
 0x178   : > { %p1210_p2 = scmp.lt.s32.totalorder %s1208_s13, %s1202_s15 }
 0x17a   : > { %p1211_p4 = por %p1210_p2, %p1209_p0 }
 0x17c   : > { %p1212_p8 = pnand %p1211_p4, %p1205_p9 }
 0x1d8   : > { %v534_v27 = vpop.permute.xlu1 %533  ;;  %v524_v28 = vpop.permute.xlu0 %523 }
 0x1d9   : > { %890 = vst.msk [vmem:[%s1642_s7 + $0x18] sm:$0xff] %vm429_vm2, %v534_v27  ;;  %888 = vst.msk [vmem:[%s1642_s7 + $0x8] sm:$0xff] %vm429_vm2, %v524_v28 }
 0x1dc   : > { %v529_v29 = vpop.permute.xlu0 %528  ;;  %v433_v30 = vpop.permute.xlu1 %432 }
 0x1dd   : > { %889 = vst.msk [vmem:[%s1642_s7 + $0x10] sm:$0xff] %vm429_vm2, %v529_v29  ;;  %884 = vst.msk [vmem:[%s1646_s9 + $0x8] sm:$0xff] %vm429_vm2, %v433_v30 }
 0x1de   : > { %1215 = shalt.err (!%p1212_p8)
}
 0x1df   : > { %s1216_s7 = scalar_lea.hbm %s1670_s27, 512  ;;  %s1220_s17 = scalar_lea.hbm %s1812_s5, 1024 }
 0x1e0   : > { %p1217_p1 = scmp.ne.s32.totalorder %s1670_s27, %s1216_s7  ;;  %p1221_p13 = scmp.lt.u32.totalorder %s1670_s27, %s1812_s5 }
 0x1e1   : > { %p1222_p6 = scmp.lt.u32.totalorder %s1220_s17, %s1216_s7  ;;  %p1224_p5 = scmp.lt.u32.totalorder %s1216_s7, %s1670_s27 }
 0x1e2   : > { %p1218_p12 = pnand %p1217_p1, %p1564_p10 }
 0x1e3   : > { %p1223_p3 = por %p1222_p6, %p1221_p13 }
 0x1e4   : > { %p1219_p11 = pneg %p1218_p12 }
 0x1e5   : > { %p1225_p7 = por %p1224_p5, %p1223_p3 }
 0x1e7   : > { %p1226_p9 = pnand %p1225_p7, %p1219_p11 }
 0x1e9   : > { %1229 = shalt.err (!%p1226_p9)
}
 0x1ea   : > { %s1367_s15 = smov 128   ;;  %s1368_s8 = smov 8   ;;  %v438_v31 = vpop.permute.xlu0 %437  ;;  %v443_v32 = vpop.permute.xlu1 %442 }
 0x1eb   : > { %990 = dma.vmem_to_hbm [thread:$0]  (%p1564_p10), %s1659_s30, 512, %s1670_s27, %s1678_s24, %s1367_s15, %s1367_s15, %s1368_s8  }
 0x1ec   : > { %s1709_s12 = scalar_lea.hbm %s1811_s4, %s1657_s11  ;;  %885 = vst.msk [vmem:[%s1646_s9 + $0x10] sm:$0xff] %vm429_vm2, %v438_v31  ;;  %886 = vst.msk [vmem:[%s1646_s9 + $0x18] sm:$0xff] %vm429_vm2, %v443_v32  ;;  %s630_s19 = scalar_lea.sflag [#allocation4], %s1619_s21 }
 0x1ed   : > { %s1230_s17 = scalar_lea.vmem %s1672_s20, 512  ;;  %s1369_s14 = smov [#allocation10]  }
 0x1ee   : > { %p1231_p0 = scmp.ne.s32.totalorder %s1672_s20, %s1230_s17  ;;  %s1234_s29 = sshll.u32 %s1369_s14, 4  ;;  %s1235_s29 = int_to_ptr.vmem [resolvable:$false] %s1234_s29 }
 0x1ef   : > { %s1236_s30 = scalar_lea.vmem %s1235_s29, 1024  ;;  %p1237_p8 = scmp.lt.s32.totalorder %s1672_s20, %s1235_s29 }
 0x1f0   : > { %p1232_p2 = pnand %p1231_p0, %p1564_p10  ;;  %p1238_p1 = scmp.lt.s32.totalorder %s1236_s30, %s1230_s17 }
 0x1f2   : > { %p1233_p4 = pneg %p1232_p2  ;;  %p1239_p12 = por %p1238_p1, %p1237_p8 }
 0x1f4   : > { %p1240_p11 = pnand %p1239_p12, %p1233_p4 }
 0x1f6   : > { %1243 = shalt.err (!%p1240_p11)
}
 0x1f7   : > { %s1244_s9 = scalar_lea.hbm %s1709_s12, 512  ;;  %s1248_s7 = scalar_lea.hbm %s1811_s4, 1024 }
 0x1f8   : > { %p1245_p13 = scmp.ne.s32.totalorder %s1709_s12, %s1244_s9  ;;  %p1249_p5 = scmp.lt.u32.totalorder %s1709_s12, %s1811_s4 }
 0x1f9   : > { %p1250_p7 = scmp.lt.u32.totalorder %s1248_s7, %s1244_s9  ;;  %p1252_p0 = scmp.lt.u32.totalorder %s1244_s9, %s1709_s12 }
 0x1fa   : > { %p1246_p6 = pnand %p1245_p13, %p1564_p10 }
 0x1fb   : > { %p1251_p9 = por %p1250_p7, %p1249_p5 }
 0x1fc   : > { %p1247_p3 = pneg %p1246_p6 }
 0x1fd   : > { %p1253_p2 = por %p1252_p0, %p1251_p9 }
 0x1ff   : > { %p1254_p4 = pnand %p1253_p2, %p1247_p3 }
 0x201   : > { %1257 = shalt.err (!%p1254_p4)
}
 0x202   : > { %989 = dma.vmem_to_hbm [thread:$0]  (%p1564_p10), %s1672_s20, 512, %s1709_s12, %s630_s19, %s1367_s15, %s1367_s15, %s1368_s8   ;;  %v620_v33 = vpop.permute.xlu1 %619  ;;  %v615_v34 = vpop.permute.xlu0 %614 }
 0x203   : > { %s688_s17 = sshll.u32 %s1650_s18, 4  ;;  %893 = vst.msk [vmem:[%s1650_s18 + $0x10] sm:$0xff] %vm429_vm2, %v620_v33  ;;  %892 = vst.msk [vmem:[%s1650_s18 + $0x8] sm:$0xff] %vm429_vm2, %v615_v34  ;;  %s1753_s9 = scalar_lea.hbm %s1813_s6, %s1657_s11  ;;  %s1747_s17 = int_to_ptr.vmem [resolvable:$true] %s688_s17 }
 0x204   : > { %s1258_s20 = scalar_lea.vmem %s1747_s17, 512  ;;  %s1370_s12 = smov [#allocation13]  }
 0x205   : > { %p1259_p8 = scmp.ne.s32.totalorder %s1747_s17, %s1258_s20  ;;  %s1262_s19 = sshll.u32 %s1370_s12, 4  ;;  %s1263_s19 = int_to_ptr.vmem [resolvable:$false] %s1262_s19 }
 0x206   : > { %v625_v35 = vpop.permute.xlu0 %624  ;;  %s1264_s27 = scalar_lea.vmem %s1263_s19, 1024  ;;  %p1265_p11 = scmp.lt.s32.totalorder %s1747_s17, %s1263_s19 }
 0x207   : > { %894 = vst.msk [vmem:[%s1650_s18 + $0x18] sm:$0xff] %vm429_vm2, %v625_v35  ;;  %p1260_p1 = pnand %p1259_p8, %p1564_p10  ;;  %p1266_p13 = scmp.lt.s32.totalorder %s1264_s27, %s1258_s20 }
 0x209   : > { %p1261_p12 = pneg %p1260_p1  ;;  %p1267_p6 = por %p1266_p13, %p1265_p11 }
 0x20b   : > { %p1268_p3 = pnand %p1267_p6, %p1261_p12 }
 0x20d   : > { %1271 = shalt.err (!%p1268_p3)
}
 0x20e   : > { %s1272_s18 = scalar_lea.hbm %s1753_s9, 512  ;;  %s1276_s7 = scalar_lea.hbm %s1813_s6, 1024 }
 0x20f   : > { %p1273_p5 = scmp.ne.s32.totalorder %s1753_s9, %s1272_s18  ;;  %p1277_p0 = scmp.lt.u32.totalorder %s1753_s9, %s1813_s6 }
 0x210   : > { %p1278_p2 = scmp.lt.u32.totalorder %s1276_s7, %s1272_s18  ;;  %p1280_p8 = scmp.lt.u32.totalorder %s1272_s18, %s1753_s9 }
 0x211   : > { %p1274_p7 = pnand %p1273_p5, %p1564_p10 }
 0x212   : > { %p1279_p4 = por %p1278_p2, %p1277_p0 }
 0x213   : > { %p1275_p9 = pneg %p1274_p7 }
 0x214   : > { %p1281_p1 = por %p1280_p8, %p1279_p4 }
 0x216   : > { %p1282_p12 = pnand %p1281_p1, %p1275_p9 }
 0x218   : > { %1285 = shalt.err (!%p1282_p12)
}
 0x219   : > { %991 = dma.vmem_to_hbm [thread:$0]  (%p1564_p10), %s1747_s17, 512, %s1753_s9, %s1678_s24, %s1367_s15, %s1367_s15, %s1368_s8  }
 0x21a PF: > { %s1836_s30 = sld [smem:[#allocation19_spill]]  ;;  %s1837_s21 = sld [smem:[#allocation20_spill]] }
 0x21b   : > { %p1839_p13 = scmp.ge.s32.totalorder %s1352_s26, 2 }
 0x220   : > { %s703_s20 = sand.u32 1, %s1836_s30   ;;  %p1838_p11 = scmp.ne.s32.totalorder %s1837_s21, 0 }
 0x221   : > { %s704_s12 = scalar_lea.sflag [#allocation4], %s703_s20 }
 0x222   : > { %p1010_p6 = pnand %p1839_p13, %p1838_p11 }
 0x224   : > { %1323 = dma.done.wait (!%p1010_p6), %s704_s12, 512  }
 0x225   : > { %1325 = vsyncadd (!%p1010_p6), %s704_s12, 4294966784  ;;  %s1840_s28 = sadd.s32 4294967294, %s1352_s26  }
 0x226   : > { %s712_s19 = sand.u32 1, %s1840_s28  }
 0x227   : > { %s713_s27 = scalar_lea.sflag [#allocation12], %s712_s19 }
 0x228   : > { %1327 = dma.done.wait (!%p1010_p6), %s713_s27, 1024  }
 0x229   : > { %1329 = vsyncadd (!%p1010_p6), %s713_s27, 4294966272  ;;  %s28_s26 = sadd.s32 1, %s1352_s26   ;;  %s1841_s21 = smov %s1336_s22 }
 0x22a   : > { %p25_p10 = scmp.ge.s32.totalorder %s28_s26, 4   ;;  %s1842_s22 = smov %s1340_s23 }
 0x22b   : > { %s1843_s23 = smov %s1576_s16  ;;  %s1844_s24 = smov %s1348_s25 }
 0x22c   : > { %s1845_s25 = smov %s1847_s10  ;;  %27 = sbr.rel (!%p25_p10) target bundleno = 10 (0xa), region = 134 }
 0x233   :  { %727 = vsyncpa [#allocation3], 1 }
 0x234   :  { %729 = vsyncpa [#allocation3 + $0x1], 1 }
 0x235   :  { %730 = vsyncpa [#allocation6], 1 }
 0x236   :  { %731 = vsyncpa [#allocation9], 1 }
 0x237   :  { %732 = vsyncpa [#allocation4], 1 }
 0x238   :  { %734 = vsyncpa [#allocation4 + $0x1], 1 }
 0x239   :  { %735 = vsyncpa [#allocation12], 1 }
 0x23a   :  { %737 = vsyncpa [#allocation12 + $0x1], 1 }

</bundles_post_ra>
